<compile_context>
chip_gen: v7x
topology: tpu7x:2x2x1
jax: 0.10.0
libtpu: 0.0.40
codegen_flags: <defaults>
</compile_context>

<pallas_src>
import jax
import jax.numpy as jnp
import numpy as np
from jax import lax
from jax.experimental import pallas as pl
from jax.experimental.pallas import tpu as pltpu


def _round_up(x, m):
    return ((x + m - 1) // m) * m


# ------------------------------ Pallas wrapper ------------------------------

def conv3x3_out_pallas(x_nchw, params):
    """Forward pass of conv3x3_out. x_nchw: (B, Cin, H, W) f32; params in PyTorch
    layouts (OIHW weights, (C,) biases)."""
    w1, b1, w2, b2, w3, b3 = params
    B, Cin, H, W = x_nchw.shape
    Cmid = w1.shape[0]
    Cout = w3.shape[0]

    # Flat "wrap trick" geometry.  The zero-padded image lives in a flat buffer with
    # row pitch P; every 3x3 tap is then a single lane-offset slice of that buffer.
    # The pad/junk columns of one layer double as the zero padding of the next.
    P = W + 2                       # row pitch of the padded grid (minimum legal)
    Hp = H + 2                      # padded height
    L = Hp * P                      # padded-grid flat length
    M2 = H * P                      # conv2 output length (cols >= W per row are junk)
    RS = M2 + 2 * P + 2             # conv1 output length (covers every conv2 tap)
    XR = _round_up(RS + 2 * P + 2, 128)   # extended, lane-aligned input length

    # Input block (B, Cin, XR): channel-major like NCHW (no transpose), long spatial
    # axis last -> lane-dense DMA.  Extended pos e <-> padded-grid index e - (P+1).
    xb = jnp.pad(x_nchw.astype(jnp.float32),
                 ((0, 0), (0, 0), (1, 1), (1, P - W - 1)))        # (B, Cin, Hp, P)
    xb = xb.reshape(B, Cin, L)
    xb = jnp.pad(xb, ((0, 0), (0, 0), (P + 1, XR - (P + 1) - L)))  # (B, Cin, XR)

    # Weights -> (tap, Cout_layer, Cin_layer); biases -> (C, 1) columns (broadcast
    # over the lane/spatial axis inside the kernel).
    w1k = jnp.transpose(w1, (2, 3, 0, 1)).reshape(9, Cmid, Cin).astype(jnp.float32)
    w2k = jnp.transpose(w2, (2, 3, 0, 1)).reshape(9, Cmid, Cmid).astype(jnp.float32)
    w3k = w3.reshape(Cout, Cmid).astype(jnp.float32)
    b1k = b1.reshape(Cmid, 1).astype(jnp.float32)
    b2k = b2.reshape(Cmid, 1).astype(jnp.float32)
    b3k = b3.reshape(Cout, 1).astype(jnp.float32)

    def kernel(x_ref, w1_ref, b1_ref, w2_ref, b2_ref, w3_ref, b3_ref,
               o_ref, h1_ref):
        # ---- layer 1: 3x3 conv + bias; 9 tap partials accumulated in registers ----
        acc1 = jnp.broadcast_to(b1_ref[...], (Cmid, RS))
        for ky in range(3):
            for kx in range(3):
                xt = x_ref[:, pl.ds(ky * P + kx, RS)]            # (Cin, RS) lane-dense
                acc1 = acc1 + jnp.dot(w1_ref[ky * 3 + kx], xt,
                                      preferred_element_type=jnp.float32)

        # ReLU + interior mask, generated in-kernel from a lane iota: the masked h1
        # is exactly the zero-padded input of layer 2.  Written to VMEM once.
        q = lax.broadcasted_iota(jnp.int32, (1, RS), 1)
        # row index via exact f32 multiply + truncate (avoids vector integer div)
        r = ((q.astype(jnp.float32) + 0.5) * (1.0 / P)).astype(jnp.int32)
        c = q - r * P
        interior = (r >= 1) & (r <= H) & (c >= 1) & (c <= W)
        h1_ref[...] = jnp.where(interior, jnp.maximum(acc1, 0.0), 0.0)

        # ---- layer 2: 3x3 conv + bias via the same wrap trick, then ReLU ---------
        acc2 = jnp.broadcast_to(b2_ref[...], (Cmid, M2))
        for ky in range(3):
            for kx in range(3):
                ht = h1_ref[:, pl.ds(ky * P + kx, M2)]           # (Cmid, M2)
                acc2 = acc2 + jnp.dot(w2_ref[ky * 3 + kx], ht,
                                      preferred_element_type=jnp.float32)
        h2 = jnp.maximum(acc2, 0.0)                              # (Cmid, M2)

        # Drop the P-W junk columns per image row (static lane slices + concat) so
        # the 1x1 conv and the output store are fully lane-dense -- no transpose.
        h2i = jnp.concatenate([h2[:, i * P:i * P + W] for i in range(H)],
                              axis=1)                            # (Cmid, H*W)

        # ---- layer 3: 1x1 conv + bias + sigmoid, lane-dense (Cout, H*W) ----------
        y = jnp.dot(w3_ref[...], h2i,
                    preferred_element_type=jnp.float32) + b3_ref[...]
        o_ref[...] = jax.nn.sigmoid(y).astype(o_ref.dtype)

    out_flat = pl.pallas_call(
        kernel,
        out_shape=jax.ShapeDtypeStruct((B, Cout, H * W), jnp.float32),
        grid_spec=pltpu.PrefetchScalarGridSpec(
            num_scalar_prefetch=0,
            grid=(B,),
            in_specs=[
                pl.BlockSpec((None, Cin, XR), lambda b: (b, 0, 0)),
                pl.BlockSpec((9, Cmid, Cin), lambda b: (0, 0, 0)),
                pl.BlockSpec((Cmid, 1), lambda b: (0, 0)),
                pl.BlockSpec((9, Cmid, Cmid), lambda b: (0, 0, 0)),
                pl.BlockSpec((Cmid, 1), lambda b: (0, 0)),
                pl.BlockSpec((Cout, Cmid), lambda b: (0, 0)),
                pl.BlockSpec((Cout, 1), lambda b: (0, 0)),
            ],
            out_specs=pl.BlockSpec((None, Cout, H * W), lambda b: (b, 0, 0)),
            scratch_shapes=[pltpu.VMEM((Cmid, RS), jnp.float32)],   # masked h1
        ),
        compiler_params=pltpu.CompilerParams(
            dimension_semantics=("parallel",),    # B>=2 keeps both v7x TCs busy
        ),
    )(xb, w1k, b1k, w2k, b2k, w3k, b3k)

    # (B, Cout, H*W) is already NCHW-ordered -> free reshape (no transpose / slice).
    # NOTE: for large images add a row-tiled grid axis (2-row halo); size tiles
    # against 64 MiB VMEM on v7x (vs 128 MiB on v5e/v6e).
    return out_flat.reshape(B, Cout, H, W)


# ------------------------ pure-JAX reference (check) ------------------------

def conv3x3_out_ref(x_nchw, params):
    w1, b1, w2, b2, w3, b3 = params

    def conv(z, w, b, pad):
        y = lax.conv_general_dilated(
            z, w, window_strides=(1, 1), padding=[(pad, pad), (pad, pad)],
            dimension_numbers=("NCHW", "OIHW", "NCHW"),
            precision=lax.Precision.HIGHEST)
        return y + b.reshape(1, -1, 1, 1)

    h = jax.nn.relu(conv(x_nchw, w1, b1, 1))
    h = jax.nn.relu(conv(h, w2, b2, 1))
    return jax.nn.sigmoid(conv(h, w3, b3, 0))


# --------------------------------- main -------------------------------------

if __name__ == "__main__":
    B, Cin, Cmid, Cout, H, W = 2, 4, 8, 3, 16, 16

    key = jax.random.PRNGKey(0)
    kx, k1, k2, k3, k4, k5, k6 = jax.random.split(key, 7)

    # Parameters in PyTorch nn.Conv2d layouts (OIHW weights, (C,) biases).
    w1 = 0.1 * jax.random.normal(k1, (Cmid, Cin, 3, 3), jnp.float32)
    b1 = 0.1 * jax.random.normal(k2, (Cmid,), jnp.float32)
    w2 = 0.1 * jax.random.normal(k3, (Cmid, Cmid, 3, 3), jnp.float32)
    b2 = 0.1 * jax.random.normal(k4, (Cmid,), jnp.float32)
    w3 = 0.1 * jax.random.normal(k5, (Cout, Cmid, 1, 1), jnp.float32)
    b3 = 0.1 * jax.random.normal(k6, (Cout,), jnp.float32)
    params = (w1, b1, w2, b2, w3, b3)

    x = jax.random.normal(kx, (B, Cin, H, W), jnp.float32)

    fwd = jax.jit(conv3x3_out_pallas)
    out = jax.block_until_ready(fwd(x, params))

    ref = jax.block_until_ready(conv3x3_out_ref(x, params))
    np.testing.assert_allclose(np.asarray(out), np.asarray(ref),
                               rtol=1e-2, atol=1e-2)

    print("KERNEL_OK")
</pallas_src>

<mosaic_0001>
module attributes {stable_mosaic.version = 11 : i64} {
  func.func @kernel(%arg0: i32, %arg1: memref<1x4x384xf32, #tpu.memory_space<vmem>>, %arg2: memref<9x8x4xf32, #tpu.memory_space<vmem>>, %arg3: memref<8x1xf32, #tpu.memory_space<vmem>>, %arg4: memref<9x8x8xf32, #tpu.memory_space<vmem>>, %arg5: memref<8x1xf32, #tpu.memory_space<vmem>>, %arg6: memref<3x8xf32, #tpu.memory_space<vmem>>, %arg7: memref<3x1xf32, #tpu.memory_space<vmem>>, %arg8: memref<1x3x256xf32, #tpu.memory_space<vmem>>, %arg9: memref<8x326xf32, #tpu.memory_space<vmem>>) attributes {dimension_semantics = [#tpu.dimension_semantics<parallel>], iteration_bounds = array<i64: 2>, scalar_prefetch = 0 : i64, scratch_operands = 1 : i64, tpu.core_type = #tpu.core_type<tc>, window_params = [{transform_indices = @transform_0, window_bounds = array<i64: 1, 4, 384>}, {pipeline_mode = #tpu.pipeline_mode<synchronous>, transform_indices = @transform_1, window_bounds = array<i64: 9, 8, 4>}, {pipeline_mode = #tpu.pipeline_mode<synchronous>, transform_indices = @transform_2, window_bounds = array<i64: 8, 1>}, {pipeline_mode = #tpu.pipeline_mode<synchronous>, transform_indices = @transform_3, window_bounds = array<i64: 9, 8, 8>}, {pipeline_mode = #tpu.pipeline_mode<synchronous>, transform_indices = @transform_4, window_bounds = array<i64: 8, 1>}, {pipeline_mode = #tpu.pipeline_mode<synchronous>, transform_indices = @transform_5, window_bounds = array<i64: 3, 8>}, {pipeline_mode = #tpu.pipeline_mode<synchronous>, transform_indices = @transform_6, window_bounds = array<i64: 3, 1>}, {transform_indices = @transform_7, window_bounds = array<i64: 1, 3, 256>}]} {
    %c0 = arith.constant 0 : index
    %c0_0 = arith.constant 0 : index
    %0 = vector.load %arg3[%c0, %c0_0] : memref<8x1xf32, #tpu.memory_space<vmem>>, vector<8x1xf32>
    %1 = vector.shape_cast %0 : vector<8x1xf32> to vector<8x1xf32>
    %2 = vector.broadcast %1 : vector<8x1xf32> to vector<8x326xf32>
    %c0_1 = arith.constant 0 : index
    %c0_2 = arith.constant 0 : index
    %c0_3 = arith.constant 0 : index
    %3 = vector.load %arg1[%c0_1, %c0_2, %c0_3] : memref<1x4x384xf32, #tpu.memory_space<vmem>>, vector<1x4x326xf32>
    %4 = vector.shape_cast %3 : vector<1x4x326xf32> to vector<4x326xf32>
    %c0_4 = arith.constant 0 : index
    %c0_5 = arith.constant 0 : index
    %c0_6 = arith.constant 0 : index
    %5 = vector.load %arg2[%c0_4, %c0_5, %c0_6] : memref<9x8x4xf32, #tpu.memory_space<vmem>>, vector<1x8x4xf32>
    %6 = vector.shape_cast %5 : vector<1x8x4xf32> to vector<8x4xf32>
    %cst = arith.constant dense<0.000000e+00> : vector<8x326xf32>
    %7 = tpu.matmul %6, %4, %cst {dimension_numbers = #tpu.dot_dimension_numbers<[1], [0], [0], [1], [0, 0, 1, 1], [], []>} : vector<8x4xf32>, vector<4x326xf32>, vector<8x326xf32> -> vector<8x326xf32>
    %8 = arith.addf %2, %7 : vector<8x326xf32>
    %c0_7 = arith.constant 0 : index
    %c0_8 = arith.constant 0 : index
    %c1 = arith.constant 1 : index
    %9 = vector.load %arg1[%c0_7, %c0_8, %c1] : memref<1x4x384xf32, #tpu.memory_space<vmem>>, vector<1x4x326xf32>
    %10 = vector.shape_cast %9 : vector<1x4x326xf32> to vector<4x326xf32>
    %c1_9 = arith.constant 1 : index
    %c0_10 = arith.constant 0 : index
    %c0_11 = arith.constant 0 : index
    %11 = vector.load %arg2[%c1_9, %c0_10, %c0_11] : memref<9x8x4xf32, #tpu.memory_space<vmem>>, vector<1x8x4xf32>
    %12 = vector.shape_cast %11 : vector<1x8x4xf32> to vector<8x4xf32>
    %cst_12 = arith.constant dense<0.000000e+00> : vector<8x326xf32>
    %13 = tpu.matmul %12, %10, %cst_12 {dimension_numbers = #tpu.dot_dimension_numbers<[1], [0], [0], [1], [0, 0, 1, 1], [], []>} : vector<8x4xf32>, vector<4x326xf32>, vector<8x326xf32> -> vector<8x326xf32>
    %14 = arith.addf %8, %13 : vector<8x326xf32>
    %c0_13 = arith.constant 0 : index
    %c0_14 = arith.constant 0 : index
    %c2 = arith.constant 2 : index
    %15 = vector.load %arg1[%c0_13, %c0_14, %c2] : memref<1x4x384xf32, #tpu.memory_space<vmem>>, vector<1x4x326xf32>
    %16 = vector.shape_cast %15 : vector<1x4x326xf32> to vector<4x326xf32>
    %c2_15 = arith.constant 2 : index
    %c0_16 = arith.constant 0 : index
    %c0_17 = arith.constant 0 : index
    %17 = vector.load %arg2[%c2_15, %c0_16, %c0_17] : memref<9x8x4xf32, #tpu.memory_space<vmem>>, vector<1x8x4xf32>
    %18 = vector.shape_cast %17 : vector<1x8x4xf32> to vector<8x4xf32>
    %cst_18 = arith.constant dense<0.000000e+00> : vector<8x326xf32>
    %19 = tpu.matmul %18, %16, %cst_18 {dimension_numbers = #tpu.dot_dimension_numbers<[1], [0], [0], [1], [0, 0, 1, 1], [], []>} : vector<8x4xf32>, vector<4x326xf32>, vector<8x326xf32> -> vector<8x326xf32>
    %20 = arith.addf %14, %19 : vector<8x326xf32>
    %c0_19 = arith.constant 0 : index
    %c0_20 = arith.constant 0 : index
    %c18 = arith.constant 18 : index
    %21 = vector.load %arg1[%c0_19, %c0_20, %c18] : memref<1x4x384xf32, #tpu.memory_space<vmem>>, vector<1x4x326xf32>
    %22 = vector.shape_cast %21 : vector<1x4x326xf32> to vector<4x326xf32>
    %c3 = arith.constant 3 : index
    %c0_21 = arith.constant 0 : index
    %c0_22 = arith.constant 0 : index
    %23 = vector.load %arg2[%c3, %c0_21, %c0_22] : memref<9x8x4xf32, #tpu.memory_space<vmem>>, vector<1x8x4xf32>
    %24 = vector.shape_cast %23 : vector<1x8x4xf32> to vector<8x4xf32>
    %cst_23 = arith.constant dense<0.000000e+00> : vector<8x326xf32>
    %25 = tpu.matmul %24, %22, %cst_23 {dimension_numbers = #tpu.dot_dimension_numbers<[1], [0], [0], [1], [0, 0, 1, 1], [], []>} : vector<8x4xf32>, vector<4x326xf32>, vector<8x326xf32> -> vector<8x326xf32>
    %26 = arith.addf %20, %25 : vector<8x326xf32>
    %c0_24 = arith.constant 0 : index
    %c0_25 = arith.constant 0 : index
    %c19 = arith.constant 19 : index
    %27 = vector.load %arg1[%c0_24, %c0_25, %c19] : memref<1x4x384xf32, #tpu.memory_space<vmem>>, vector<1x4x326xf32>
    %28 = vector.shape_cast %27 : vector<1x4x326xf32> to vector<4x326xf32>
    %c4 = arith.constant 4 : index
    %c0_26 = arith.constant 0 : index
    %c0_27 = arith.constant 0 : index
    %29 = vector.load %arg2[%c4, %c0_26, %c0_27] : memref<9x8x4xf32, #tpu.memory_space<vmem>>, vector<1x8x4xf32>
    %30 = vector.shape_cast %29 : vector<1x8x4xf32> to vector<8x4xf32>
    %cst_28 = arith.constant dense<0.000000e+00> : vector<8x326xf32>
    %31 = tpu.matmul %30, %28, %cst_28 {dimension_numbers = #tpu.dot_dimension_numbers<[1], [0], [0], [1], [0, 0, 1, 1], [], []>} : vector<8x4xf32>, vector<4x326xf32>, vector<8x326xf32> -> vector<8x326xf32>
    %32 = arith.addf %26, %31 : vector<8x326xf32>
    %c0_29 = arith.constant 0 : index
    %c0_30 = arith.constant 0 : index
    %c20 = arith.constant 20 : index
    %33 = vector.load %arg1[%c0_29, %c0_30, %c20] : memref<1x4x384xf32, #tpu.memory_space<vmem>>, vector<1x4x326xf32>
    %34 = vector.shape_cast %33 : vector<1x4x326xf32> to vector<4x326xf32>
    %c5 = arith.constant 5 : index
    %c0_31 = arith.constant 0 : index
    %c0_32 = arith.constant 0 : index
    %35 = vector.load %arg2[%c5, %c0_31, %c0_32] : memref<9x8x4xf32, #tpu.memory_space<vmem>>, vector<1x8x4xf32>
    %36 = vector.shape_cast %35 : vector<1x8x4xf32> to vector<8x4xf32>
    %cst_33 = arith.constant dense<0.000000e+00> : vector<8x326xf32>
    %37 = tpu.matmul %36, %34, %cst_33 {dimension_numbers = #tpu.dot_dimension_numbers<[1], [0], [0], [1], [0, 0, 1, 1], [], []>} : vector<8x4xf32>, vector<4x326xf32>, vector<8x326xf32> -> vector<8x326xf32>
    %38 = arith.addf %32, %37 : vector<8x326xf32>
    %c0_34 = arith.constant 0 : index
    %c0_35 = arith.constant 0 : index
    %c36 = arith.constant 36 : index
    %39 = vector.load %arg1[%c0_34, %c0_35, %c36] : memref<1x4x384xf32, #tpu.memory_space<vmem>>, vector<1x4x326xf32>
    %40 = vector.shape_cast %39 : vector<1x4x326xf32> to vector<4x326xf32>
    %c6 = arith.constant 6 : index
    %c0_36 = arith.constant 0 : index
    %c0_37 = arith.constant 0 : index
    %41 = vector.load %arg2[%c6, %c0_36, %c0_37] : memref<9x8x4xf32, #tpu.memory_space<vmem>>, vector<1x8x4xf32>
    %42 = vector.shape_cast %41 : vector<1x8x4xf32> to vector<8x4xf32>
    %cst_38 = arith.constant dense<0.000000e+00> : vector<8x326xf32>
    %43 = tpu.matmul %42, %40, %cst_38 {dimension_numbers = #tpu.dot_dimension_numbers<[1], [0], [0], [1], [0, 0, 1, 1], [], []>} : vector<8x4xf32>, vector<4x326xf32>, vector<8x326xf32> -> vector<8x326xf32>
    %44 = arith.addf %38, %43 : vector<8x326xf32>
    %c0_39 = arith.constant 0 : index
    %c0_40 = arith.constant 0 : index
    %c37 = arith.constant 37 : index
    %45 = vector.load %arg1[%c0_39, %c0_40, %c37] : memref<1x4x384xf32, #tpu.memory_space<vmem>>, vector<1x4x326xf32>
    %46 = vector.shape_cast %45 : vector<1x4x326xf32> to vector<4x326xf32>
    %c7 = arith.constant 7 : index
    %c0_41 = arith.constant 0 : index
    %c0_42 = arith.constant 0 : index
    %47 = vector.load %arg2[%c7, %c0_41, %c0_42] : memref<9x8x4xf32, #tpu.memory_space<vmem>>, vector<1x8x4xf32>
    %48 = vector.shape_cast %47 : vector<1x8x4xf32> to vector<8x4xf32>
    %cst_43 = arith.constant dense<0.000000e+00> : vector<8x326xf32>
    %49 = tpu.matmul %48, %46, %cst_43 {dimension_numbers = #tpu.dot_dimension_numbers<[1], [0], [0], [1], [0, 0, 1, 1], [], []>} : vector<8x4xf32>, vector<4x326xf32>, vector<8x326xf32> -> vector<8x326xf32>
    %50 = arith.addf %44, %49 : vector<8x326xf32>
    %c0_44 = arith.constant 0 : index
    %c0_45 = arith.constant 0 : index
    %c38 = arith.constant 38 : index
    %51 = vector.load %arg1[%c0_44, %c0_45, %c38] : memref<1x4x384xf32, #tpu.memory_space<vmem>>, vector<1x4x326xf32>
    %52 = vector.shape_cast %51 : vector<1x4x326xf32> to vector<4x326xf32>
    %c8 = arith.constant 8 : index
    %c0_46 = arith.constant 0 : index
    %c0_47 = arith.constant 0 : index
    %53 = vector.load %arg2[%c8, %c0_46, %c0_47] : memref<9x8x4xf32, #tpu.memory_space<vmem>>, vector<1x8x4xf32>
    %54 = vector.shape_cast %53 : vector<1x8x4xf32> to vector<8x4xf32>
    %cst_48 = arith.constant dense<0.000000e+00> : vector<8x326xf32>
    %55 = tpu.matmul %54, %52, %cst_48 {dimension_numbers = #tpu.dot_dimension_numbers<[1], [0], [0], [1], [0, 0, 1, 1], [], []>} : vector<8x4xf32>, vector<4x326xf32>, vector<8x326xf32> -> vector<8x326xf32>
    %56 = arith.addf %50, %55 : vector<8x326xf32>
    %57 = tpu.iota {dimensions = array<i32: 1>} : vector<1x326xi32>
    %58 = arith.sitofp %57 : vector<1x326xi32> to vector<1x326xf32>
    %cst_49 = arith.constant 5.000000e-01 : f32
    %59 = vector.broadcast %cst_49 : f32 to vector<1x326xf32>
    %60 = arith.addf %58, %59 : vector<1x326xf32>
    %cst_50 = arith.constant 0.055555556 : f32
    %61 = vector.broadcast %cst_50 : f32 to vector<1x326xf32>
    %62 = arith.mulf %60, %61 : vector<1x326xf32>
    %63 = arith.fptosi %62 : vector<1x326xf32> to vector<1x326xi32>
    %c18_i32 = arith.constant 18 : i32
    %64 = vector.broadcast %c18_i32 : i32 to vector<1x326xi32>
    %65 = arith.muli %63, %64 : vector<1x326xi32>
    %66 = arith.subi %57, %65 : vector<1x326xi32>
    %c1_i32 = arith.constant 1 : i32
    %67 = vector.broadcast %c1_i32 : i32 to vector<1x326xi32>
    %68 = arith.cmpi sge, %63, %67 : vector<1x326xi32>
    %c16_i32 = arith.constant 16 : i32
    %69 = vector.broadcast %c16_i32 : i32 to vector<1x326xi32>
    %70 = arith.cmpi sle, %63, %69 : vector<1x326xi32>
    %71 = arith.andi %68, %70 : vector<1x326xi1>
    %c1_i32_51 = arith.constant 1 : i32
    %72 = vector.broadcast %c1_i32_51 : i32 to vector<1x326xi32>
    %73 = arith.cmpi sge, %66, %72 : vector<1x326xi32>
    %74 = arith.andi %71, %73 : vector<1x326xi1>
    %c16_i32_52 = arith.constant 16 : i32
    %75 = vector.broadcast %c16_i32_52 : i32 to vector<1x326xi32>
    %76 = arith.cmpi sle, %66, %75 : vector<1x326xi32>
    %77 = arith.andi %74, %76 : vector<1x326xi1>
    %cst_53 = arith.constant 0.000000e+00 : f32
    %78 = vector.broadcast %cst_53 : f32 to vector<8x326xf32>
    %79 = arith.maximumf %56, %78 : vector<8x326xf32>
    %cst_54 = arith.constant 0.000000e+00 : f32
    %80 = vector.shape_cast %77 : vector<1x326xi1> to vector<1x326xi1>
    %81 = vector.broadcast %80 : vector<1x326xi1> to vector<8x326xi1>
    %82 = vector.broadcast %cst_54 : f32 to vector<8x326xf32>
    %83 = arith.select %81, %79, %82 : vector<8x326xi1>, vector<8x326xf32>
    %c0_55 = arith.constant 0 : index
    %c0_56 = arith.constant 0 : index
    %84 = vector.load %arg9[%c0_55, %c0_56] : memref<8x326xf32, #tpu.memory_space<vmem>>, vector<8x326xf32>
    tpu.vector_store %arg9[%c0_55, %c0_56], %83 {strides = array<i32>} : memref<8x326xf32, #tpu.memory_space<vmem>>, vector<8x326xf32>,
    %c0_57 = arith.constant 0 : index
    %c0_58 = arith.constant 0 : index
    %85 = vector.load %arg5[%c0_57, %c0_58] : memref<8x1xf32, #tpu.memory_space<vmem>>, vector<8x1xf32>
    %86 = vector.shape_cast %85 : vector<8x1xf32> to vector<8x1xf32>
    %87 = vector.broadcast %86 : vector<8x1xf32> to vector<8x288xf32>
    %c0_59 = arith.constant 0 : index
    %c0_60 = arith.constant 0 : index
    %88 = vector.load %arg9[%c0_59, %c0_60] : memref<8x326xf32, #tpu.memory_space<vmem>>, vector<8x288xf32>
    %c0_61 = arith.constant 0 : index
    %c0_62 = arith.constant 0 : index
    %c0_63 = arith.constant 0 : index
    %89 = vector.load %arg4[%c0_61, %c0_62, %c0_63] : memref<9x8x8xf32, #tpu.memory_space<vmem>>, vector<1x8x8xf32>
    %90 = vector.shape_cast %89 : vector<1x8x8xf32> to vector<8x8xf32>
    %cst_64 = arith.constant dense<0.000000e+00> : vector<8x288xf32>
    %91 = tpu.matmul %90, %88, %cst_64 {dimension_numbers = #tpu.dot_dimension_numbers<[1], [0], [0], [1], [0, 0, 1, 1], [], []>} : vector<8x8xf32>, vector<8x288xf32>, vector<8x288xf32> -> vector<8x288xf32>
    %92 = arith.addf %87, %91 : vector<8x288xf32>
    %c0_65 = arith.constant 0 : index
    %c1_66 = arith.constant 1 : index
    %93 = vector.load %arg9[%c0_65, %c1_66] : memref<8x326xf32, #tpu.memory_space<vmem>>, vector<8x288xf32>
    %c1_67 = arith.constant 1 : index
    %c0_68 = arith.constant 0 : index
    %c0_69 = arith.constant 0 : index
    %94 = vector.load %arg4[%c1_67, %c0_68, %c0_69] : memref<9x8x8xf32, #tpu.memory_space<vmem>>, vector<1x8x8xf32>
    %95 = vector.shape_cast %94 : vector<1x8x8xf32> to vector<8x8xf32>
    %cst_70 = arith.constant dense<0.000000e+00> : vector<8x288xf32>
    %96 = tpu.matmul %95, %93, %cst_70 {dimension_numbers = #tpu.dot_dimension_numbers<[1], [0], [0], [1], [0, 0, 1, 1], [], []>} : vector<8x8xf32>, vector<8x288xf32>, vector<8x288xf32> -> vector<8x288xf32>
    %97 = arith.addf %92, %96 : vector<8x288xf32>
    %c0_71 = arith.constant 0 : index
    %c2_72 = arith.constant 2 : index
    %98 = vector.load %arg9[%c0_71, %c2_72] : memref<8x326xf32, #tpu.memory_space<vmem>>, vector<8x288xf32>
    %c2_73 = arith.constant 2 : index
    %c0_74 = arith.constant 0 : index
    %c0_75 = arith.constant 0 : index
    %99 = vector.load %arg4[%c2_73, %c0_74, %c0_75] : memref<9x8x8xf32, #tpu.memory_space<vmem>>, vector<1x8x8xf32>
    %100 = vector.shape_cast %99 : vector<1x8x8xf32> to vector<8x8xf32>
    %cst_76 = arith.constant dense<0.000000e+00> : vector<8x288xf32>
    %101 = tpu.matmul %100, %98, %cst_76 {dimension_numbers = #tpu.dot_dimension_numbers<[1], [0], [0], [1], [0, 0, 1, 1], [], []>} : vector<8x8xf32>, vector<8x288xf32>, vector<8x288xf32> -> vector<8x288xf32>
    %102 = arith.addf %97, %101 : vector<8x288xf32>
    %c0_77 = arith.constant 0 : index
    %c18_78 = arith.constant 18 : index
    %103 = vector.load %arg9[%c0_77, %c18_78] : memref<8x326xf32, #tpu.memory_space<vmem>>, vector<8x288xf32>
    %c3_79 = arith.constant 3 : index
    %c0_80 = arith.constant 0 : index
    %c0_81 = arith.constant 0 : index
    %104 = vector.load %arg4[%c3_79, %c0_80, %c0_81] : memref<9x8x8xf32, #tpu.memory_space<vmem>>, vector<1x8x8xf32>
    %105 = vector.shape_cast %104 : vector<1x8x8xf32> to vector<8x8xf32>
    %cst_82 = arith.constant dense<0.000000e+00> : vector<8x288xf32>
    %106 = tpu.matmul %105, %103, %cst_82 {dimension_numbers = #tpu.dot_dimension_numbers<[1], [0], [0], [1], [0, 0, 1, 1], [], []>} : vector<8x8xf32>, vector<8x288xf32>, vector<8x288xf32> -> vector<8x288xf32>
    %107 = arith.addf %102, %106 : vector<8x288xf32>
    %c0_83 = arith.constant 0 : index
    %c19_84 = arith.constant 19 : index
    %108 = vector.load %arg9[%c0_83, %c19_84] : memref<8x326xf32, #tpu.memory_space<vmem>>, vector<8x288xf32>
    %c4_85 = arith.constant 4 : index
    %c0_86 = arith.constant 0 : index
    %c0_87 = arith.constant 0 : index
    %109 = vector.load %arg4[%c4_85, %c0_86, %c0_87] : memref<9x8x8xf32, #tpu.memory_space<vmem>>, vector<1x8x8xf32>
    %110 = vector.shape_cast %109 : vector<1x8x8xf32> to vector<8x8xf32>
    %cst_88 = arith.constant dense<0.000000e+00> : vector<8x288xf32>
    %111 = tpu.matmul %110, %108, %cst_88 {dimension_numbers = #tpu.dot_dimension_numbers<[1], [0], [0], [1], [0, 0, 1, 1], [], []>} : vector<8x8xf32>, vector<8x288xf32>, vector<8x288xf32> -> vector<8x288xf32>
    %112 = arith.addf %107, %111 : vector<8x288xf32>
    %c0_89 = arith.constant 0 : index
    %c20_90 = arith.constant 20 : index
    %113 = vector.load %arg9[%c0_89, %c20_90] : memref<8x326xf32, #tpu.memory_space<vmem>>, vector<8x288xf32>
    %c5_91 = arith.constant 5 : index
    %c0_92 = arith.constant 0 : index
    %c0_93 = arith.constant 0 : index
    %114 = vector.load %arg4[%c5_91, %c0_92, %c0_93] : memref<9x8x8xf32, #tpu.memory_space<vmem>>, vector<1x8x8xf32>
    %115 = vector.shape_cast %114 : vector<1x8x8xf32> to vector<8x8xf32>
    %cst_94 = arith.constant dense<0.000000e+00> : vector<8x288xf32>
    %116 = tpu.matmul %115, %113, %cst_94 {dimension_numbers = #tpu.dot_dimension_numbers<[1], [0], [0], [1], [0, 0, 1, 1], [], []>} : vector<8x8xf32>, vector<8x288xf32>, vector<8x288xf32> -> vector<8x288xf32>
    %117 = arith.addf %112, %116 : vector<8x288xf32>
    %c0_95 = arith.constant 0 : index
    %c36_96 = arith.constant 36 : index
    %118 = vector.load %arg9[%c0_95, %c36_96] : memref<8x326xf32, #tpu.memory_space<vmem>>, vector<8x288xf32>
    %c6_97 = arith.constant 6 : index
    %c0_98 = arith.constant 0 : index
    %c0_99 = arith.constant 0 : index
    %119 = vector.load %arg4[%c6_97, %c0_98, %c0_99] : memref<9x8x8xf32, #tpu.memory_space<vmem>>, vector<1x8x8xf32>
    %120 = vector.shape_cast %119 : vector<1x8x8xf32> to vector<8x8xf32>
    %cst_100 = arith.constant dense<0.000000e+00> : vector<8x288xf32>
    %121 = tpu.matmul %120, %118, %cst_100 {dimension_numbers = #tpu.dot_dimension_numbers<[1], [0], [0], [1], [0, 0, 1, 1], [], []>} : vector<8x8xf32>, vector<8x288xf32>, vector<8x288xf32> -> vector<8x288xf32>
    %122 = arith.addf %117, %121 : vector<8x288xf32>
    %c0_101 = arith.constant 0 : index
    %c37_102 = arith.constant 37 : index
    %123 = vector.load %arg9[%c0_101, %c37_102] : memref<8x326xf32, #tpu.memory_space<vmem>>, vector<8x288xf32>
    %c7_103 = arith.constant 7 : index
    %c0_104 = arith.constant 0 : index
    %c0_105 = arith.constant 0 : index
    %124 = vector.load %arg4[%c7_103, %c0_104, %c0_105] : memref<9x8x8xf32, #tpu.memory_space<vmem>>, vector<1x8x8xf32>
    %125 = vector.shape_cast %124 : vector<1x8x8xf32> to vector<8x8xf32>
    %cst_106 = arith.constant dense<0.000000e+00> : vector<8x288xf32>
    %126 = tpu.matmul %125, %123, %cst_106 {dimension_numbers = #tpu.dot_dimension_numbers<[1], [0], [0], [1], [0, 0, 1, 1], [], []>} : vector<8x8xf32>, vector<8x288xf32>, vector<8x288xf32> -> vector<8x288xf32>
    %127 = arith.addf %122, %126 : vector<8x288xf32>
    %c0_107 = arith.constant 0 : index
    %c38_108 = arith.constant 38 : index
    %128 = vector.load %arg9[%c0_107, %c38_108] : memref<8x326xf32, #tpu.memory_space<vmem>>, vector<8x288xf32>
    %c8_109 = arith.constant 8 : index
    %c0_110 = arith.constant 0 : index
    %c0_111 = arith.constant 0 : index
    %129 = vector.load %arg4[%c8_109, %c0_110, %c0_111] : memref<9x8x8xf32, #tpu.memory_space<vmem>>, vector<1x8x8xf32>
    %130 = vector.shape_cast %129 : vector<1x8x8xf32> to vector<8x8xf32>
    %cst_112 = arith.constant dense<0.000000e+00> : vector<8x288xf32>
    %131 = tpu.matmul %130, %128, %cst_112 {dimension_numbers = #tpu.dot_dimension_numbers<[1], [0], [0], [1], [0, 0, 1, 1], [], []>} : vector<8x8xf32>, vector<8x288xf32>, vector<8x288xf32> -> vector<8x288xf32>
    %132 = arith.addf %127, %131 : vector<8x288xf32>
    %cst_113 = arith.constant 0.000000e+00 : f32
    %133 = vector.broadcast %cst_113 : f32 to vector<8x288xf32>
    %134 = arith.maximumf %132, %133 : vector<8x288xf32>
    %135 = vector.extract_strided_slice %134 {offsets = [0, 0], sizes = [8, 16], strides = [1, 1]} : vector<8x288xf32> to vector<8x16xf32>
    %136 = vector.extract_strided_slice %134 {offsets = [0, 18], sizes = [8, 16], strides = [1, 1]} : vector<8x288xf32> to vector<8x16xf32>
    %137 = vector.extract_strided_slice %134 {offsets = [0, 36], sizes = [8, 16], strides = [1, 1]} : vector<8x288xf32> to vector<8x16xf32>
    %138 = vector.extract_strided_slice %134 {offsets = [0, 54], sizes = [8, 16], strides = [1, 1]} : vector<8x288xf32> to vector<8x16xf32>
    %139 = vector.extract_strided_slice %134 {offsets = [0, 72], sizes = [8, 16], strides = [1, 1]} : vector<8x288xf32> to vector<8x16xf32>
    %140 = vector.extract_strided_slice %134 {offsets = [0, 90], sizes = [8, 16], strides = [1, 1]} : vector<8x288xf32> to vector<8x16xf32>
    %141 = vector.extract_strided_slice %134 {offsets = [0, 108], sizes = [8, 16], strides = [1, 1]} : vector<8x288xf32> to vector<8x16xf32>
    %142 = vector.extract_strided_slice %134 {offsets = [0, 126], sizes = [8, 16], strides = [1, 1]} : vector<8x288xf32> to vector<8x16xf32>
    %143 = vector.extract_strided_slice %134 {offsets = [0, 144], sizes = [8, 16], strides = [1, 1]} : vector<8x288xf32> to vector<8x16xf32>
    %144 = vector.extract_strided_slice %134 {offsets = [0, 162], sizes = [8, 16], strides = [1, 1]} : vector<8x288xf32> to vector<8x16xf32>
    %145 = vector.extract_strided_slice %134 {offsets = [0, 180], sizes = [8, 16], strides = [1, 1]} : vector<8x288xf32> to vector<8x16xf32>
    %146 = vector.extract_strided_slice %134 {offsets = [0, 198], sizes = [8, 16], strides = [1, 1]} : vector<8x288xf32> to vector<8x16xf32>
    %147 = vector.extract_strided_slice %134 {offsets = [0, 216], sizes = [8, 16], strides = [1, 1]} : vector<8x288xf32> to vector<8x16xf32>
    %148 = vector.extract_strided_slice %134 {offsets = [0, 234], sizes = [8, 16], strides = [1, 1]} : vector<8x288xf32> to vector<8x16xf32>
    %149 = vector.extract_strided_slice %134 {offsets = [0, 252], sizes = [8, 16], strides = [1, 1]} : vector<8x288xf32> to vector<8x16xf32>
    %150 = vector.extract_strided_slice %134 {offsets = [0, 270], sizes = [8, 16], strides = [1, 1]} : vector<8x288xf32> to vector<8x16xf32>
    %151 = tpu.concatenate %135, %136, %137, %138, %139, %140, %141, %142, %143, %144, %145, %146, %147, %148, %149, %150 in 1 : vector<8x16xf32>, vector<8x16xf32>, vector<8x16xf32>, vector<8x16xf32>, vector<8x16xf32>, vector<8x16xf32>, vector<8x16xf32>, vector<8x16xf32>, vector<8x16xf32>, vector<8x16xf32>, vector<8x16xf32>, vector<8x16xf32>, vector<8x16xf32>, vector<8x16xf32>, vector<8x16xf32>, vector<8x16xf32> -> vector<8x256xf32>
    %c0_114 = arith.constant 0 : index
    %c0_115 = arith.constant 0 : index
    %152 = vector.load %arg6[%c0_114, %c0_115] : memref<3x8xf32, #tpu.memory_space<vmem>>, vector<3x8xf32>
    %cst_116 = arith.constant dense<0.000000e+00> : vector<3x256xf32>
    %153 = tpu.matmul %152, %151, %cst_116 {dimension_numbers = #tpu.dot_dimension_numbers<[1], [0], [0], [1], [0, 0, 1, 1], [], []>} : vector<3x8xf32>, vector<8x256xf32>, vector<3x256xf32> -> vector<3x256xf32>
    %c0_117 = arith.constant 0 : index
    %c0_118 = arith.constant 0 : index
    %154 = vector.load %arg7[%c0_117, %c0_118] : memref<3x1xf32, #tpu.memory_space<vmem>>, vector<3x1xf32>
    %155 = vector.broadcast %154 : vector<3x1xf32> to vector<3x256xf32>
    %156 = arith.addf %153, %155 : vector<3x256xf32>
    %157 = arith.negf %156 : vector<3x256xf32>
    %158 = math.exp %157 : vector<3x256xf32>
    %cst_119 = arith.constant 1.000000e+00 : f32
    %159 = vector.broadcast %cst_119 : f32 to vector<3x256xf32>
    %160 = arith.addf %159, %158 : vector<3x256xf32>
    %161 = arith.divf %159, %160 : vector<3x256xf32>
    %c0_120 = arith.constant 0 : index
    %c0_121 = arith.constant 0 : index
    %c0_122 = arith.constant 0 : index
    %162 = vector.load %arg8[%c0_120, %c0_121, %c0_122] : memref<1x3x256xf32, #tpu.memory_space<vmem>>, vector<1x3x256xf32>
    %163 = vector.shape_cast %162 : vector<1x3x256xf32> to vector<3x256xf32>
    %164 = vector.shape_cast %161 : vector<3x256xf32> to vector<1x3x256xf32>
    tpu.vector_store %arg8[%c0_120, %c0_121, %c0_122], %164 {strides = array<i32>} : memref<1x3x256xf32, #tpu.memory_space<vmem>>, vector<1x3x256xf32>,
    return
  }
  func.func @transform_0(%arg0: i32) -> (i32, i32, i32) {
    %c0_i32 = arith.constant 0 : i32
    %c0_i32_0 = arith.constant 0 : i32
    %c0_i32_1 = arith.constant 0 : i32
    return %arg0, %c0_i32, %c0_i32_0 : i32, i32, i32
  }
  func.func @transform_1(%arg0: i32) -> (i32, i32, i32) {
    %c0_i32 = arith.constant 0 : i32
    %c0_i32_0 = arith.constant 0 : i32
    %c0_i32_1 = arith.constant 0 : i32
    %c0_i32_2 = arith.constant 0 : i32
    return %c0_i32, %c0_i32_0, %c0_i32_1 : i32, i32, i32
  }
  func.func @transform_2(%arg0: i32) -> (i32, i32) {
    %c0_i32 = arith.constant 0 : i32
    %c0_i32_0 = arith.constant 0 : i32
    %c0_i32_1 = arith.constant 0 : i32
    return %c0_i32, %c0_i32_0 : i32, i32
  }
  func.func @transform_3(%arg0: i32) -> (i32, i32, i32) {
    %c0_i32 = arith.constant 0 : i32
    %c0_i32_0 = arith.constant 0 : i32
    %c0_i32_1 = arith.constant 0 : i32
    %c0_i32_2 = arith.constant 0 : i32
    return %c0_i32, %c0_i32_0, %c0_i32_1 : i32, i32, i32
  }
  func.func @transform_4(%arg0: i32) -> (i32, i32) {
    %c0_i32 = arith.constant 0 : i32
    %c0_i32_0 = arith.constant 0 : i32
    %c0_i32_1 = arith.constant 0 : i32
    return %c0_i32, %c0_i32_0 : i32, i32
  }
  func.func @transform_5(%arg0: i32) -> (i32, i32) {
    %c0_i32 = arith.constant 0 : i32
    %c0_i32_0 = arith.constant 0 : i32
    %c0_i32_1 = arith.constant 0 : i32
    return %c0_i32, %c0_i32_0 : i32, i32
  }
  func.func @transform_6(%arg0: i32) -> (i32, i32) {
    %c0_i32 = arith.constant 0 : i32
    %c0_i32_0 = arith.constant 0 : i32
    %c0_i32_1 = arith.constant 0 : i32
    return %c0_i32, %c0_i32_0 : i32, i32
  }
  func.func @transform_7(%arg0: i32) -> (i32, i32, i32) {
    %c0_i32 = arith.constant 0 : i32
    %c0_i32_0 = arith.constant 0 : i32
    %c0_i32_1 = arith.constant 0 : i32
    return %arg0, %c0_i32, %c0_i32_0 : i32, i32, i32
  }
}

</mosaic_0001>

<bundles_post_ra>
// kernel: conv3x3_out_pallas.1
= control target key start
LH: loop header
LB: loop body
LE: loop exit
PB: predicated region body
PF: predicated region fallthrough
CT: control target
= control target key end

     0   :  { %s3941_s24 = smov 0   ;;  %s4260_s0 = inlined_call_operand.vmem [shape: f32[2,4,384], index: 0, kind: input, shape index: {}]   ;;  %s4261_s1 = inlined_call_operand.vmem [shape: f32[9,8,4], index: 1, kind: input, shape index: {}]   ;;  %s4262_s2 = inlined_call_operand.vmem [shape: f32[8,1], index: 2, kind: input, shape index: {}]   ;;  %s4263_s3 = inlined_call_operand.vmem [shape: f32[9,8,8], index: 3, kind: input, shape index: {}]   ;;  %s4264_s4 = inlined_call_operand.vmem [shape: f32[8,1], index: 4, kind: input, shape index: {}]   ;;  %s4265_s5 = inlined_call_operand.vmem [shape: f32[3,8], index: 5, kind: input, shape index: {}]   ;;  %s4266_s6 = inlined_call_operand.vmem [shape: f32[3,1], index: 6, kind: input, shape index: {}]   ;;  %s4267_s7 = inlined_call_operand.vmem [shape: f32[2,3,256], index: 7, kind: output, shape index: {}]  }
   0x1 LB: > { %s3531_s25 = sadd.s32 4294967295, %s3876_s24   ;;  %p3535_p0 = scmp.ge.s32.totalorder %s3876_s24, 1  ;;  %s3876_s24 = sphi %s3941_s24, %s17_s24  }
   0x2   : > { %p237_p1 = scmp.lt.s32.totalorder %s3876_s24, 3 }
   0x4   : > { %p238_p2 = pnand %p3535_p0, %p237_p1 }
   0x5   : > { %p269_p3 = scmp.lt.s32.totalorder (!%p238_p2), %s3531_s25, 1  ;;  %v3878_v0 = vmov (!%p238_p2), 0.0   ;;  %vm4276_vm0 = vmmov (!%p238_p2), 0   ;;  %vm295_vm1 = vcmask (!%p238_p2), 1043456   ;;  %s3880_s30 = smov (!%p238_p2), 127   ;;  %v287_v3 = vld [vmem:[%s4261_s1] sm:$0xff] (!%p238_p2)  ;;  %v1798_v63 = vlaneseq (!%p238_p2) }
   0x6   : > { %241 = sbr.rel (%p238_p2) target bundleno = 1206 (0x4b6), region = 48  ;;  %3660 = vmatprep.subr.mxu1 (!%p238_p2), %v3878_v0  ;;  %3662 = vmatprep.mubr.msk.f32.mxu1 (!%p238_p2), %vm4276_vm0, %v3878_v0  ;;  %vm291_vm2 = vcmask (!%p238_p2), 31744   ;;  %s3881_s10 = smov (!%p238_p2), 126   ;;  %v279_v13 = vld [vmem:[%s4262_s2] sm:$0xff] (!%p238_p2)  ;;  %v3888_v14 = vmov (!%p238_p2), 0   ;;  %vm4275_vm3 = vcmask (!%p238_p2), 1039360  }
   0x7   : > { %366 = vmatprep.mubr.f32.mxu0 (!%p238_p2), %v3878_v0  ;;  %s3882_s11 = smov (!%p238_p2), 110   ;;  %s3883_s12 = smov (!%p238_p2), 109   ;;  %3858 = vset.pattern.permute.xlu0 (!%p238_p2), %v3888_v14  ;;  %v3544_v18 = vld [vmem:[%s4261_s1 + $0x8] sm:$0xff] (!%p238_p2)  ;;  %vm4274_vm4 = vcmask (!%p238_p2), 1031168   ;;  %vm4273_vm5 = vcmask (!%p238_p2), 900096   ;;  %v3550_v27 = vld [vmem:[%s4261_s1 + $0x10] sm:$0xff] (!%p238_p2) }
   0x8   : > { %s3884_s13 = smov (!%p238_p2), 108   ;;  %s3885_s14 = smov (!%p238_p2), 92   ;;  %vm4272_vm6 = vcmask (!%p238_p2), 891904   ;;  %v3556_v34 = vld [vmem:[%s4261_s1 + $0x18] sm:$0xff] (!%p238_p2)  ;;  %vm4271_vm7 = vcmask (!%p238_p2), 883712   ;;  %v3562_v42 = vld [vmem:[%s4261_s1 + $0x20] sm:$0xff] (!%p238_p2) }
   0x9   : > { %s3886_s15 = smov (!%p238_p2), 91   ;;  %s3887_s16 = smov (!%p238_p2), 90   ;;  %vm4270_vm8 = vcmask (!%p238_p2), 752640   ;;  %v3568_v48 = vld [vmem:[%s4261_s1 + $0x28] sm:$0xff] (!%p238_p2)  ;;  %vm4269_vm9 = vcmask (!%p238_p2), 744448   ;;  %v3574_v54 = vld [vmem:[%s4261_s1 + $0x30] sm:$0xff] (!%p238_p2) }
   0xa   : > { %vm4268_vm10 = vcmask (!%p238_p2), 736256   ;;  %v3580_v59 = vld [vmem:[%s4261_s1 + $0x38] sm:$0xff] (!%p238_p2)  ;;  %v3586_v62 = vld [vmem:[%s4261_s1 + $0x40] sm:$0xff] (!%p238_p2)  ;;  %s3892_s27 = smov (!%p238_p2), 122   ;;  %s3896_s28 = smov (!%p238_p2), 104  }
   0xb   : > { %s3899_s8 = smov (!%p238_p2), 112  }
   0xd   : > { %s4296_s25 = smov (!%p269_p3, %s3531_s25), 1 }
   0xe   : > { %s3820_s26 = smul.u32 12, %s4296_s25  ;;  %s3623_s19 = sshll.u32 %s4296_s25, 3 }
   0xf   : > { %s278_s22 = scalar_lea.vmem %s4267_s7, %s3623_s19 }
  0x10   : > { %s3959_s29 = scalar_lea.vmem %s4260_s0, %s3820_s26  ;;  %s3890_s26 = smov 116  }
  0x11   : > { %v446_v1 = vld [vmem:[%s3959_s29] sm:$0xff]  ;;  %v286_v4 = vld [vmem:[%s3959_s29 + $0x8] sm:$0xf] }
  0x12   : > { %453 = vrot.lane.b32.xlu1 %v446_v1, %s3880_s30  ;;  %v452_v2 = vcombine.high %v446_v1, %v446_v1  ;;  %v447_v5 = vld [vmem:[%s3959_s29 + $0x8] sm:$0xf]  ;;  %3661 = vmatpush3.msk.msra.mxu1 %vm295_vm1, %v286_v4 }
  0x13   : > { %3663 = vmatmul.mubr.msk.f32.vlgmr.msra.gmra.mrb[0].mxu1 %vm291_vm2, %v287_v3  ;;  %3665 = vmatprep.subr.mxu1 %v3878_v0  ;;  %v616_v6 = vld [vmem:[%s3959_s29 + $0x8] sm:$0xf] }
  0x14   : > { %455 = vrot.lane.b32.xlu0 %v452_v2, %s3880_s30  ;;  %3539 = vmatprep.subr.msk.mxu0 %vm295_vm1, %v452_v2  ;;  %v785_v7 = vld [vmem:[%s3959_s29 + $0x8] sm:$0xf] }
  0x15   : > { %3540 = vmatpush1.msk.msra.mxu0 %vm295_vm1, %v446_v1  ;;  %3667 = vmatprep.mubr.msk.f32.mxu1 %vm4276_vm0, %v3878_v0  ;;  %v954_v8 = vld [vmem:[%s3959_s29 + $0x8] sm:$0xf] }
  0x16   : > { %624 = vrot.lane.b32.xlu1 %v452_v2, %s3881_s10  ;;  %3541 = vmatmul.mubr.msk.f32.vlgmr.msra.gmra.mrb[0].mxu0 %vm291_vm2, %v287_v3  ;;  %v1123_v9 = vld [vmem:[%s3959_s29 + $0x8] sm:$0xf] }
  0x17   : > { %535 = vmatprep.mubr.f32.mxu0 %v3878_v0  ;;  %v1292_v10 = vld [vmem:[%s3959_s29 + $0x8] sm:$0xf] }
  0x18   : > { %457 = vrot.lane.b32.xlu0 %v447_v5, %s3880_s30  ;;  %v1461_v11 = vld [vmem:[%s3959_s29 + $0x8] sm:$0xf] }
  0x19   : > { %v1630_v12 = vld [vmem:[%s3959_s29 + $0x8] sm:$0xf]  ;;  %s3898_s29 = smov 102  }
  0x1a   : > { %622 = vrot.lane.b32.xlu1 %v446_v1, %s3881_s10 }
  0x1c   : > { %626 = vrot.lane.b32.xlu0 %v616_v6, %s3881_s10 }
  0x1e   : > { %795 = vrot.lane.b32.xlu1 %v785_v7, %s3882_s11 }
  0x20   : > { %793 = vrot.lane.b32.xlu0 %v452_v2, %s3882_s11 }
  0x22   : > { %962 = vrot.lane.b32.xlu1 %v452_v2, %s3883_s12 }
  0x24   : > { %791 = vrot.lane.b32.xlu0 %v446_v1, %s3882_s11 }
  0x26   : > { %960 = vrot.lane.b32.xlu1 %v446_v1, %s3883_s12 }
  0x28   : > { %964 = vrot.lane.b32.xlu0 %v954_v8, %s3883_s12 }
  0x2a   : > { %1133 = vrot.lane.b32.xlu1 %v1123_v9, %s3884_s13 }
  0x2c   : > { %1131 = vrot.lane.b32.xlu0 %v452_v2, %s3884_s13 }
  0x2e   : > { %1300 = vrot.lane.b32.xlu1 %v452_v2, %s3885_s14 }
  0x30   : > { %1129 = vrot.lane.b32.xlu0 %v446_v1, %s3884_s13 }
  0x32   : > { %1298 = vrot.lane.b32.xlu1 %v446_v1, %s3885_s14 }
  0x34   : > { %1302 = vrot.lane.b32.xlu0 %v1292_v10, %s3885_s14 }
  0x36   : > { %1471 = vrot.lane.b32.xlu1 %v1461_v11, %s3886_s15 }
  0x38   : > { %1469 = vrot.lane.b32.xlu0 %v452_v2, %s3886_s15 }
  0x3a   : > { %1638 = vrot.lane.b32.xlu1 %v452_v2, %s3887_s16 }
  0x3c   : > { %1467 = vrot.lane.b32.xlu0 %v446_v1, %s3886_s15 }
  0x3e   : > { %1636 = vrot.lane.b32.xlu1 %v446_v1, %s3887_s16  ;;  %v1799_v1 = vand.u32 127, %v1798_v63 }
  0x40   : > { %1640 = vrot.lane.b32.xlu0 %v1630_v12, %s3887_s16  ;;  %v1801_v2 = vadd.s32 256, %v1799_v1  ;;  %v1800_v4 = vadd.s32 128, %v1799_v1  ;;  %v1802_v6 = vcvt.s32.f32 %v1799_v1 }
  0x42   : > { %v1804_v3 = vcvt.s32.f32 %v1801_v2  ;;  %v1803_v7 = vcvt.s32.f32 %v1800_v4  ;;  %v1805_v9 = vadd.f32 0.5, %v1802_v6 }
  0x44   : > { %282 = vperm.xlu0 %3858, %v279_v13   ;;  %v1807_v5 = vadd.f32 0.5, %v1804_v3  ;;  %v1806_v10 = vadd.f32 0.5, %v1803_v7  ;;  %v1808_v12 = vmul.f32 0.055555556, %v1805_v9 }
  0x46   : > { %v1810_v8 = vmul.f32 0.055555556, %v1807_v5  ;;  %v1809_v13 = vmul.f32 0.055555556, %v1806_v10 }
  0x48   : > { %v3825_v11 = vtrunc.f32 %v1810_v8 }
  0x4a   : > { %v3826_v14 = vcvt.f32.s32 %v3825_v11  ;;  %v3606_v11 = vld [vmem:[%s4263_s3 + $0x28] sm:$0xff] }
  0x4c   : > { %vm1822_vm11 = vcmp.ge.s32.totalorder %v3826_v14, 1  ;;  %vm1825_vm12 = vcmp.le.s32.totalorder %v3826_v14, 16 }
  0x4d   : > { %vm1828_vm13 = vmand %vm1822_vm11, %vm1825_vm12 }
  0x84   : > { %v454_v15 = vpop.permute.xlu1 %453 }
  0x86   : > { %v456_v16 = vpop.permute.xlu0 %455 }
  0x87   : > { %v460_v21 = vsel %vm4275_vm3, %v454_v15, %v456_v16  ;;  %v3821_v15 = vtrunc.f32 %v1808_v12 }
  0x88   : > { %v625_v17 = vpop.permute.xlu1 %624 }
  0x8a   : > { %v458_v19 = vpop.permute.xlu0 %457 }
  0x8b   : > { %v461_v20 = vsel %vm4275_vm3, %v456_v16, %v458_v19  ;;  %3666 = vmatpush3.msk.msra.mxu1 %vm295_vm1, %v458_v19  ;;  %v3823_v16 = vtrunc.f32 %v1809_v13 }
  0x8c   : > { %3545 = vmatprep.subr.msk.mxu0 %vm295_vm1, %v461_v20  ;;  %3668 = vmatmul.mubr.msk.f32.vlgmr.msra.gmra.mrb[0].mxu1 %vm291_vm2, %v3544_v18  ;;  %v623_v22 = vpop.permute.xlu1 %622 }
  0x8d   : > { %3546 = vmatpush1.msk.msra.mxu0 %vm295_vm1, %v460_v21  ;;  %3670 = vmatprep.subr.mxu1 %v3878_v0  ;;  %v629_v24 = vsel %vm4274_vm4, %v623_v22, %v625_v17  ;;  %v3824_v19 = vcvt.f32.s32 %v3823_v16 }
  0x8e   : > { %v627_v23 = vpop.permute.xlu0 %626  ;;  %3547 = vmatmul.mubr.msk.f32.vlgmr.msra.gmra.mrb[0].mxu0 %vm291_vm2, %v3544_v18  ;;  %3672 = vmatprep.mubr.msk.f32.mxu1 %vm4276_vm0, %v3878_v0  ;;  %v3822_v18 = vcvt.f32.s32 %v3821_v15 }
  0x8f   : > { %v630_v25 = vsel %vm4274_vm4, %v625_v17, %v627_v23  ;;  %3671 = vmatpush3.msk.msra.mxu1 %vm295_vm1, %v627_v23  ;;  %704 = vmatprep.mubr.f32.mxu0 %v3878_v0  ;;  %v1816_v17 = vmul.u32 18, %v3826_v14  ;;  %v1815_v22 = vmul.u32 18, %v3824_v19 }
  0x90   : > { %3551 = vmatprep.subr.msk.mxu0 %vm295_vm1, %v630_v25  ;;  %v796_v26 = vpop.permute.xlu1 %795  ;;  %3675 = vmatprep.subr.mxu1 %v3878_v0  ;;  %v1814_v21 = vmul.u32 18, %v3822_v18  ;;  %vm1820_vm15 = vcmp.ge.s32.totalorder %v3822_v18, 1 }
  0x91   : > { %3552 = vmatpush1.msk.msra.mxu0 %vm295_vm1, %v629_v24  ;;  %v1819_v20 = vsub.s32 %v1801_v2, %v1816_v17  ;;  %v1818_v24 = vsub.s32 %v1800_v4, %v1815_v22  ;;  %v3603_v4 = vld [vmem:[%s4263_s3 + $0x20] sm:$0xff] }
  0x92   : > { %v794_v28 = vpop.permute.xlu0 %793  ;;  %v1817_v23 = vsub.s32 %v1799_v1, %v1814_v21 }
  0x93   : > { %v799_v29 = vsel %vm4273_vm5, %v794_v28, %v796_v26  ;;  %vm1831_vm14 = vcmp.ge.s32.totalorder %v1819_v20, 1  ;;  %vm1830_vm4 = vcmp.ge.s32.totalorder %v1818_v24, 1 }
  0x94   : > { %3673 = vmatmul.mubr.msk.f32.vlgmr.msra.gmra.mrb[0].mxu1 %vm291_vm2, %v3550_v27  ;;  %3557 = vmatprep.subr.msk.mxu0 %vm295_vm1, %v799_v29  ;;  %v963_v30 = vpop.permute.xlu1 %962  ;;  %vm1835_vm11 = vcmp.le.s32.totalorder %v1817_v23, 16 }
  0x95   : > { %3676 = vmatpush3.msk.msra.mxu1 %vm295_vm1, %v796_v26  ;;  %3677 = vmatprep.mubr.msk.f32.mxu1 %vm4276_vm0, %v3878_v0 }
  0x96   : > { %3553 = vmatmul.mubr.msk.f32.vlgmr.msra.gmra.mrb[0].mxu0 %vm291_vm2, %v3550_v27  ;;  %v792_v31 = vpop.permute.xlu0 %791  ;;  %3680 = vmatprep.subr.mxu1 %v3878_v0 }
  0x97   : > { %v798_v32 = vsel %vm4273_vm5, %v792_v31, %v794_v28  ;;  %873 = vmatprep.mubr.f32.mxu0 %v3878_v0 }
  0x98   : > { %3558 = vmatpush1.msk.msra.mxu0 %vm295_vm1, %v798_v32  ;;  %v961_v33 = vpop.permute.xlu1 %960 }
  0x99   : > { %v967_v37 = vsel %vm4272_vm6, %v961_v33, %v963_v30 }
  0x9a   : > { %v965_v35 = vpop.permute.xlu0 %964 }
  0x9b   : > { %v968_v36 = vsel %vm4272_vm6, %v963_v30, %v965_v35  ;;  %vm1829_vm6 = vcmp.ge.s32.totalorder %v1817_v23, 1  ;;  %v3612_v23 = vld [vmem:[%s4263_s3 + $0x38] sm:$0xff] }
  0x9c   : > { %3678 = vmatmul.mubr.msk.f32.vlgmr.msra.gmra.mrb[0].mxu1 %vm291_vm2, %v3556_v34  ;;  %3563 = vmatprep.subr.msk.mxu0 %vm295_vm1, %v968_v36  ;;  %v1134_v38 = vpop.permute.xlu1 %1133 }
  0x9d   : > { %3681 = vmatpush3.msk.msra.mxu1 %vm295_vm1, %v965_v35  ;;  %3682 = vmatprep.mubr.msk.f32.mxu1 %vm4276_vm0, %v3878_v0 }
  0x9e   : > { %3559 = vmatmul.mubr.msk.f32.vlgmr.msra.gmra.mrb[0].mxu0 %vm291_vm2, %v3556_v34  ;;  %v1132_v39 = vpop.permute.xlu0 %1131  ;;  %3685 = vmatprep.subr.mxu1 %v3878_v0 }
  0x9f   : > { %3564 = vmatpush1.msk.msra.mxu0 %vm295_vm1, %v967_v37  ;;  %1042 = vmatprep.mubr.f32.mxu0 %v3878_v0  ;;  %v1137_v40 = vsel %vm4271_vm7, %v1132_v39, %v1134_v38 }
  0xa0   : > { %3569 = vmatprep.subr.msk.mxu0 %vm295_vm1, %v1137_v40  ;;  %v1301_v41 = vpop.permute.xlu1 %1300 }
  0xa2   : > { %v1130_v43 = vpop.permute.xlu0 %1129 }
  0xa3   : > { %v1136_v44 = vsel %vm4271_vm7, %v1130_v43, %v1132_v39  ;;  %v1866_v39 = vld [vmem:[%s4263_s3] sm:$0xff] }
  0xa4   : > { %3683 = vmatmul.mubr.msk.f32.vlgmr.msra.gmra.mrb[0].mxu1 %vm291_vm2, %v3562_v42  ;;  %v1299_v46 = vpop.permute.xlu1 %1298 }
  0xa5   : > { %3686 = vmatpush3.msk.msra.mxu1 %vm295_vm1, %v1134_v38  ;;  %3687 = vmatprep.mubr.msk.f32.mxu1 %vm4276_vm0, %v3878_v0  ;;  %v1305_v51 = vsel %vm4270_vm8, %v1299_v46, %v1301_v41 }
  0xa6   : > { %3565 = vmatmul.mubr.msk.f32.vlgmr.msra.gmra.mrb[0].mxu0 %vm291_vm2, %v3562_v42  ;;  %v1303_v45 = vpop.permute.xlu0 %1302  ;;  %3690 = vmatprep.subr.mxu1 %v3878_v0 }
  0xa7   : > { %3570 = vmatpush1.msk.msra.mxu0 %vm295_vm1, %v1136_v44  ;;  %1211 = vmatprep.mubr.f32.mxu0 %v3878_v0  ;;  %v1306_v47 = vsel %vm4270_vm8, %v1301_v41, %v1303_v45  ;;  %vm1837_vm8 = vcmp.le.s32.totalorder %v1819_v20, 16  ;;  %v1857_v41 = vld [vmem:[%s4264_s4] sm:$0xff] }
  0xa8   : > { %3575 = vmatprep.subr.msk.mxu0 %vm295_vm1, %v1306_v47  ;;  %v1472_v50 = vpop.permute.xlu1 %1471 }
  0xaa   : > { %v1470_v49 = vpop.permute.xlu0 %1469 }
  0xab   : > { %v1475_v52 = vsel %vm4269_vm9, %v1470_v49, %v1472_v50 }
  0xac   : > { %3688 = vmatmul.mubr.msk.f32.vlgmr.msra.gmra.mrb[0].mxu1 %vm291_vm2, %v3568_v48  ;;  %v1639_v56 = vpop.permute.xlu1 %1638 }
  0xad   : > { %3691 = vmatpush3.msk.msra.mxu1 %vm295_vm1, %v1303_v45  ;;  %3692 = vmatprep.mubr.msk.f32.mxu1 %vm4276_vm0, %v3878_v0  ;;  %v3594_v45 = vld [vmem:[%s4263_s3 + $0x8] sm:$0xff] }
  0xae   : > { %3571 = vmatmul.mubr.msk.f32.vlgmr.msra.gmra.mrb[0].mxu0 %vm291_vm2, %v3568_v48  ;;  %v1468_v53 = vpop.permute.xlu0 %1467  ;;  %3695 = vmatprep.subr.mxu1 %v3878_v0 }
  0xaf   : > { %3576 = vmatpush1.msk.msra.mxu0 %vm295_vm1, %v1305_v51  ;;  %1380 = vmatprep.mubr.f32.mxu0 %v3878_v0  ;;  %v1474_v57 = vsel %vm4269_vm9, %v1468_v53, %v1470_v49  ;;  %vm1834_vm9 = vmand %vm1828_vm13, %vm1831_vm14  ;;  %vm1836_vm13 = vcmp.le.s32.totalorder %v1818_v24, 16  ;;  %vm1855_vm14 = vcmask 572416   ;;  %v3597_v53 = vld [vmem:[%s4263_s3 + $0x10] sm:$0xff] }
  0xb0   : > { %3581 = vmatprep.subr.msk.mxu0 %vm295_vm1, %v1475_v52  ;;  %v1637_v60 = vpop.permute.xlu1 %1636  ;;  %vm1840_vm3 = vmand %vm1834_vm9, %vm1837_vm8  ;;  %vm4283_vm8 = vcmask 900096  }
  0xb1   : > { %v1643_v61 = vsel %vm4268_vm10, %v1637_v60, %v1639_v56  ;;  %vm4284_vm9 = vmmov %vm4283_vm8 }
  0xb2   : > { %v1641_v55 = vpop.permute.xlu0 %1640 }
  0xb3   : > { %v1644_v58 = vsel %vm4268_vm10, %v1639_v56, %v1641_v55  ;;  %vm1824_vm10 = vcmp.le.s32.totalorder %v3824_v19, 16 }
  0xb4   : > { %3693 = vmatmul.mubr.msk.f32.vlgmr.msra.gmra.mrb[0].mxu1 %vm291_vm2, %v3574_v54 }
  0xb5   : > { %3696 = vmatpush3.msk.msra.mxu1 %vm295_vm1, %v1472_v50  ;;  %3697 = vmatprep.mubr.msk.f32.mxu1 %vm4276_vm0, %v3878_v0 }
  0xb6   : > { %3577 = vmatmul.mubr.msk.f32.vlgmr.msra.gmra.mrb[0].mxu0 %vm291_vm2, %v3574_v54  ;;  %3700 = vmatprep.subr.mxu1 %v3878_v0 }
  0xb7   : > { %3582 = vmatpush1.msk.msra.mxu0 %vm295_vm1, %v1474_v57  ;;  %1549 = vmatprep.mubr.f32.mxu0 %v3878_v0 }
  0xb8   : > { %3587 = vmatprep.subr.msk.mxu0 %vm295_vm1, %v1644_v58 }
  0xbc   : > { %3698 = vmatmul.mubr.msk.f32.vlgmr.msra.gmra.mrb[0].mxu1 %vm291_vm2, %v3580_v59 }
  0xbd   : > { %3701 = vmatpush3.msk.msra.mxu1 %vm295_vm1, %v1641_v55  ;;  %3702 = vmatprep.mubr.msk.f32.mxu1 %vm4276_vm0, %v3878_v0 }
  0xbe   : > { %3583 = vmatmul.mubr.msk.f32.vlgmr.msra.gmra.mrb[0].mxu0 %vm291_vm2, %v3580_v59  ;;  %3705 = vmatprep.subr.mxu1 %v3878_v0 }
  0xbf   : > { %3588 = vmatpush1.msk.msra.mxu0 %vm295_vm1, %v1643_v61  ;;  %1718 = vmatprep.mubr.f32.mxu0 %v3878_v0  ;;  %vm1823_vm1 = vcmp.le.s32.totalorder %v3822_v18, 16  ;;  %v3600_v61 = vld [vmem:[%s4263_s3 + $0x18] sm:$0xff]  ;;  %v3609_v18 = vld [vmem:[%s4263_s3 + $0x30] sm:$0xff] }
  0xc0   : > { %vm1826_vm7 = vmand %vm1820_vm15, %vm1823_vm1 }
  0xc3   : > { %v283_v25 = vpop.permute.xlu0 %282 }
  0xc4   : > { %3703 = vmatmul.mubr.msk.f32.vlgmr.msra.gmra.mrb[0].mxu1 %vm291_vm2, %v3586_v62 }
  0xc5   : > { %3707 = vmatprep.mubr.msk.f32.mxu1 %vm4276_vm0, %v3878_v0  ;;  %vm1832_vm0 = vmand %vm1826_vm7, %vm1829_vm6  ;;  %vm4281_vm6 = vcmask 1031168  }
  0xc6   : > { %3589 = vmatmul.mubr.msk.f32.vlgmr.msra.gmra.mrb[0].mxu0 %vm291_vm2, %v3586_v62  ;;  %vm1821_vm2 = vcmp.ge.s32.totalorder %v3824_v19, 1  ;;  %vm1838_vm1 = vmand %vm1832_vm0, %vm1835_vm11  ;;  %vm4278_vm0 = vmmov 0   ;;  %vm4287_vm11 = vcmask 883712  }
  0xc7   : > { %1935 = vmatprep.mubr.f32.mxu0 %v3878_v0  ;;  %vm1827_vm5 = vmand %vm1821_vm2, %vm1824_vm10  ;;  %vm4285_vm10 = vcmask 891904  }
  0xc8   : > { %vm1833_vm12 = vmand %vm1827_vm5, %vm1830_vm4  ;;  %vm1867_vm4 = vcmask 64512  }
  0xc9   : > { %vm1839_vm15 = vmand %vm1833_vm12, %vm1836_vm13  ;;  %vm4289_vm13 = vcmask 752640  }
  0xca   : > { %vm4282_vm7 = vmmov %vm4281_vm6 }
  0xcb   : > { %vm4286_vm2 = vmmov %vm4285_vm10 }
  0xcc   : > { %vm4288_vm12 = vmmov %vm4287_vm11 }
 0x197   : > { %v1791_v26 = vpop.f32.mrb[0].mxu1 }
 0x198   : > { %v3752_v27 = vadd.f32 %v1791_v26, %v283_v25  ;;  %v3704_v28 = vpop.f32.mrb[1].mxu1  ;;  %v3615_v26 = vld [vmem:[%s4263_s3 + $0x40] sm:$0xff] }
 0x199   : > { %v1720_v29 = vpop.f32.mrb[0].mxu0 }
 0x19a   : > { %v1843_v30 = vmax.f32 %v3752_v27, 0.0  ;;  %v3750_v31 = vadd.f32 %v1720_v29, %v283_v25  ;;  %v1722_v32 = vpop.f32.mrb[1].mxu0 }
 0x19b   : > { %v3751_v33 = vadd.f32 %v1722_v32, %v283_v25 }
 0x19c   : > { %v1852_v34 = vsel %vm1840_vm3, %v1843_v30, 0.0  ;;  %v1841_v35 = vmax.f32 %v3750_v31, 0.0  ;;  %vm4279_vm3 = vcmask 1039360  }
 0x19d   : > { %1856 = vst.msk [vmem:[#allocation2 + $0x10] sm:$0xff] %vm1855_vm14, %v1852_v34  ;;  %v1842_v36 = vmax.f32 %v3751_v33, 0.0  ;;  %vm4280_vm5 = vmmov %vm4279_vm3 }
 0x19e   : > { %v1850_v37 = vsel %vm1838_vm1, %v1841_v35, 0.0  ;;  %vm4290_vm14 = vmmov %vm4289_vm13 }
 0x19f   : > { %v1851_v38 = vsel %vm1839_vm15, %v1842_v36, 0.0  ;;  %2020 = vrot.lane.b32.xlu0 %v1850_v37, %s3880_s30  ;;  %3868 = vmatprep.subr.msk.mxu0 %vm1839_vm15, %v1842_v36 }
 0x1a0   : > { %2022 = vrot.lane.b32.xlu1 %v1851_v38, %s3880_s30  ;;  %3869 = vmatpush1.msk.msra.mxu0 %vm1838_vm1, %v1841_v35  ;;  %vm4291_vm1 = vcmask 744448  }
 0x1a1   : > { %3592 = vmatmul.mubr.msk.f32.vlgmr.msra.gmra.mrb[2].mxu0 %vm1867_vm4, %v1866_v39  ;;  %vm4292_vm15 = vmmov %vm4291_vm1 }
 0x1a2   : > { %2098 = vmatprep.mubr.f32.mxu0 %v3878_v0 }
 0x1a4   : > { %v1865_v40 = vld [vmem:[#allocation2 + $0x10] sm:$0xff] }
 0x1a5   : > { %3706 = vmatpush3.msra.mxu1 %v1865_v40  ;;  %2184 = vrot.lane.b32.xlu0 %v1865_v40, %s3881_s10 }
 0x1a6   : > { %2024 = vrot.lane.b32.xlu1 %v1865_v40, %s3880_s30  ;;  %3708 = vmatmul.mubr.msk.f32.vlgmr.msra.gmra.mrb[2].mxu1 %vm1867_vm4, %v1866_v39  ;;  %s3889_s30 = smov 100  }
 0x1a7   : > { %3710 = vmatprep.subr.mxu1 %v3878_v0  ;;  %3712 = vmatprep.mubr.msk.f32.mxu1 %vm4278_vm0, %v3878_v0 }
 0x1a9   : > { %2342 = vrot.lane.b32.xlu0 %v1851_v38, %s3882_s11 }
 0x1aa   : > { %2182 = vrot.lane.b32.xlu1 %v1851_v38, %s3881_s10 }
 0x1ad   : > { %2340 = vrot.lane.b32.xlu0 %v1850_v37, %s3882_s11 }
 0x1ae   : > { %2180 = vrot.lane.b32.xlu1 %v1850_v37, %s3881_s10 }
 0x1b1   : > { %2504 = vrot.lane.b32.xlu0 %v1865_v40, %s3883_s12 }
 0x1b2   : > { %2344 = vrot.lane.b32.xlu1 %v1865_v40, %s3882_s11 }
 0x1b5   : > { %2662 = vrot.lane.b32.xlu0 %v1851_v38, %s3884_s13 }
 0x1b6   : > { %2502 = vrot.lane.b32.xlu1 %v1851_v38, %s3883_s12 }
 0x1b9   : > { %2660 = vrot.lane.b32.xlu0 %v1850_v37, %s3884_s13 }
 0x1ba   : > { %2500 = vrot.lane.b32.xlu1 %v1850_v37, %s3883_s12  ;;  %s3891_s12 = smov 124  }
 0x1bd   : > { %2824 = vrot.lane.b32.xlu0 %v1865_v40, %s3885_s14 }
 0x1be   : > { %2664 = vrot.lane.b32.xlu1 %v1865_v40, %s3884_s13 }
 0x1c1   : > { %2982 = vrot.lane.b32.xlu0 %v1851_v38, %s3886_s15 }
 0x1c2   : > { %2822 = vrot.lane.b32.xlu1 %v1851_v38, %s3885_s14 }
 0x1c5   : > { %2980 = vrot.lane.b32.xlu0 %v1850_v37, %s3886_s15 }
 0x1c6   : > { %2820 = vrot.lane.b32.xlu1 %v1850_v37, %s3885_s14  ;;  %s3893_s14 = smov 120  }
 0x1c9   : > { %3144 = vrot.lane.b32.xlu0 %v1865_v40, %s3887_s16 }
 0x1ca   : > { %2984 = vrot.lane.b32.xlu1 %v1865_v40, %s3886_s15  ;;  %s3894_s15 = smov 106  }
 0x1cd   : > { %1860 = vperm.xlu0 %3858, %v1857_v41  }
 0x1ce   : > { %3142 = vrot.lane.b32.xlu1 %v1851_v38, %s3887_s16 }
 0x1d2   : > { %3140 = vrot.lane.b32.xlu1 %v1850_v37, %s3887_s16  ;;  %s3895_s16 = smov 118  }
 0x211   : > { %v2021_v43 = vpop.permute.xlu0 %2020 }
 0x212   : > { %v2023_v42 = vpop.permute.xlu1 %2022 }
 0x213   : > { %v2026_v48 = vsel %vm4280_vm5, %v2021_v43, %v2023_v42 }
 0x217   : > { %v2185_v44 = vpop.permute.xlu0 %2184 }
 0x218   : > { %v2025_v46 = vpop.permute.xlu1 %2024 }
 0x219   : > { %3711 = vmatpush3.msra.mxu1 %v2025_v46  ;;  %v2027_v47 = vsel %vm4279_vm3, %v2023_v42, %v2025_v46  ;;  %vm4293_vm3 = vcmask 736256  }
 0x21a   : > { %2034 = vmatprep.subr.mxu0 %v2027_v47  ;;  %3713 = vmatmul.mubr.msk.f32.vlgmr.msra.gmra.mrb[2].mxu1 %vm1867_vm4, %v3594_v45  ;;  %vm4294_vm5 = vmmov %vm4293_vm3 }
 0x21b   : > { %3715 = vmatprep.subr.mxu1 %v3878_v0  ;;  %v2343_v49 = vpop.permute.xlu0 %2342  ;;  %2035 = vmatpush1.msra.mxu0 %v2026_v48 }
 0x21c   : > { %3716 = vmatpush3.msra.mxu1 %v2185_v44  ;;  %v2183_v50 = vpop.permute.xlu1 %2182  ;;  %3595 = vmatmul.mubr.msk.f32.vlgmr.msra.gmra.mrb[2].mxu0 %vm1867_vm4, %v3594_v45 }
 0x21d   : > { %v2187_v51 = vsel %vm4281_vm6, %v2183_v50, %v2185_v44  ;;  %3717 = vmatprep.mubr.msk.f32.mxu1 %vm4278_vm0, %v3878_v0  ;;  %2258 = vmatprep.mubr.f32.mxu0 %v3878_v0  ;;  %vm3359_vm6 = vcmask 261120  }
 0x21e   : > { %2194 = vmatprep.subr.mxu0 %v2187_v51  ;;  %3720 = vmatprep.subr.mxu1 %v3878_v0 }
 0x21f   : > { %v2341_v52 = vpop.permute.xlu0 %2340 }
 0x220   : > { %v2181_v54 = vpop.permute.xlu1 %2180  ;;  %v2346_v59 = vsel %vm4284_vm9, %v2341_v52, %v2343_v49  ;;  %vm3351_vm9 = vcmask 818176  }
 0x221   : > { %v2186_v55 = vsel %vm4282_vm7, %v2181_v54, %v2183_v50  ;;  %vm3361_vm7 = vcmask 392192  }
 0x222   : > { %2195 = vmatpush1.msra.mxu0 %v2186_v55  ;;  %3718 = vmatmul.mubr.msk.f32.vlgmr.msra.gmra.mrb[2].mxu1 %vm1867_vm4, %v3597_v53 }
 0x223   : > { %v2505_v56 = vpop.permute.xlu0 %2504  ;;  %3722 = vmatprep.mubr.msk.f32.mxu1 %vm4278_vm0, %v3878_v0 }
 0x224   : > { %v2345_v57 = vpop.permute.xlu1 %2344  ;;  %3598 = vmatmul.mubr.msk.f32.vlgmr.msra.gmra.mrb[2].mxu0 %vm1867_vm4, %v3597_v53 }
 0x225   : > { %3721 = vmatpush3.msra.mxu1 %v2345_v57  ;;  %v2347_v58 = vsel %vm4283_vm8, %v2343_v49, %v2345_v57  ;;  %2418 = vmatprep.mubr.f32.mxu0 %v3878_v0  ;;  %vm3363_vm8 = vcmask 523264  }
 0x226   : > { %2354 = vmatprep.subr.mxu0 %v2347_v58  ;;  %3725 = vmatprep.subr.mxu1 %v3878_v0 }
 0x227   : > { %v2663_v60 = vpop.permute.xlu0 %2662  ;;  %2355 = vmatpush1.msra.mxu0 %v2346_v59 }
 0x228   : > { %v2503_v62 = vpop.permute.xlu1 %2502 }
 0x229   : > { %v2507_v63 = vsel %vm4285_vm10, %v2503_v62, %v2505_v56  ;;  %vm3365_vm10 = vcmask 654336  }
 0x22a   : > { %3723 = vmatmul.mubr.msk.f32.vlgmr.msra.gmra.mrb[2].mxu1 %vm1867_vm4, %v3600_v61  ;;  %2514 = vmatprep.subr.mxu0 %v2507_v63 }
 0x22b   : > { %3726 = vmatpush3.msra.mxu1 %v2505_v56  ;;  %3727 = vmatprep.mubr.msk.f32.mxu1 %vm4278_vm0, %v3878_v0  ;;  %v2661_v1 = vpop.permute.xlu0 %2660 }
 0x22c   : > { %v2501_v2 = vpop.permute.xlu1 %2500  ;;  %3601 = vmatmul.mubr.msk.f32.vlgmr.msra.gmra.mrb[2].mxu0 %vm1867_vm4, %v3600_v61  ;;  %3730 = vmatprep.subr.mxu1 %v3878_v0  ;;  %v2666_v8 = vsel %vm4288_vm12, %v2661_v1, %v2663_v60  ;;  %vm3369_vm12 = vcmask 916480  }
 0x22d   : > { %v2506_v3 = vsel %vm4286_vm2, %v2501_v2, %v2503_v62  ;;  %2578 = vmatprep.mubr.f32.mxu0 %v3878_v0  ;;  %vm3325_vm2 = vcmask 932864  }
 0x22e   : > { %2515 = vmatpush1.msra.mxu0 %v2506_v3 }
 0x22f   : > { %v2825_v7 = vpop.permute.xlu0 %2824 }
 0x230   : > { %v2665_v5 = vpop.permute.xlu1 %2664 }
 0x231   : > { %v2667_v6 = vsel %vm4287_vm11, %v2663_v60, %v2665_v5  ;;  %vm3367_vm11 = vcmask 785408  }
 0x232   : > { %3728 = vmatmul.mubr.msk.f32.vlgmr.msra.gmra.mrb[2].mxu1 %vm1867_vm4, %v3603_v4  ;;  %2674 = vmatprep.subr.mxu0 %v2667_v6 }
 0x233   : > { %3731 = vmatpush3.msra.mxu1 %v2665_v5  ;;  %3732 = vmatprep.mubr.msk.f32.mxu1 %vm4278_vm0, %v3878_v0  ;;  %v2983_v12 = vpop.permute.xlu0 %2982 }
 0x234   : > { %v2823_v9 = vpop.permute.xlu1 %2822  ;;  %3604 = vmatmul.mubr.msk.f32.vlgmr.msra.gmra.mrb[2].mxu0 %vm1867_vm4, %v3603_v4  ;;  %3735 = vmatprep.subr.mxu1 %v3878_v0 }
 0x235   : > { %2675 = vmatpush1.msra.mxu0 %v2666_v8  ;;  %v2827_v10 = vsel %vm4289_vm13, %v2823_v9, %v2825_v7  ;;  %2738 = vmatprep.mubr.f32.mxu0 %v3878_v0 }
 0x236   : > { %2834 = vmatprep.subr.mxu0 %v2827_v10 }
 0x237   : > { %v2981_v17 = vpop.permute.xlu0 %2980 }
 0x238   : > { %v2821_v13 = vpop.permute.xlu1 %2820  ;;  %v2986_v20 = vsel %vm4292_vm15, %v2981_v17, %v2983_v12 }
 0x239   : > { %v2826_v14 = vsel %vm4290_vm14, %v2821_v13, %v2823_v9 }
 0x23a   : > { %3733 = vmatmul.mubr.msk.f32.vlgmr.msra.gmra.mrb[2].mxu1 %vm1867_vm4, %v3606_v11 }
 0x23b   : > { %3736 = vmatpush3.msra.mxu1 %v2825_v7  ;;  %3737 = vmatprep.mubr.msk.f32.mxu1 %vm4278_vm0, %v3878_v0  ;;  %v3145_v21 = vpop.permute.xlu0 %3144  ;;  %v3378_v7 = vld [vmem:[%s4265_s5] sm:$0x7] }
 0x23c   : > { %v2985_v15 = vpop.permute.xlu1 %2984  ;;  %3607 = vmatmul.mubr.msk.f32.vlgmr.msra.gmra.mrb[2].mxu0 %vm1867_vm4, %v3606_v11  ;;  %3740 = vmatprep.subr.mxu1 %v3878_v0 }
 0x23d   : > { %2835 = vmatpush1.msra.mxu0 %v2826_v14  ;;  %v2987_v16 = vsel %vm4291_vm1, %v2983_v12, %v2985_v15  ;;  %2898 = vmatprep.mubr.f32.mxu0 %v3878_v0 }
 0x23e   : > { %2994 = vmatprep.subr.mxu0 %v2987_v16 }
 0x240   : > { %v3143_v19 = vpop.permute.xlu1 %3142 }
 0x241   : > { %v3147_v22 = vsel %vm4293_vm3, %v3143_v19, %v3145_v21 }
 0x242   : > { %3738 = vmatmul.mubr.msk.f32.vlgmr.msra.gmra.mrb[2].mxu1 %vm1867_vm4, %v3609_v18 }
 0x243   : > { %3741 = vmatpush3.msra.mxu1 %v2985_v15  ;;  %3742 = vmatprep.mubr.msk.f32.mxu1 %vm4278_vm0, %v3878_v0 }
 0x244   : > { %3610 = vmatmul.mubr.msk.f32.vlgmr.msra.gmra.mrb[2].mxu0 %vm1867_vm4, %v3609_v18  ;;  %3745 = vmatprep.subr.mxu1 %v3878_v0  ;;  %v3141_v24 = vpop.permute.xlu1 %3140 }
 0x245   : > { %2995 = vmatpush1.msra.mxu0 %v2986_v20  ;;  %3058 = vmatprep.mubr.f32.mxu0 %v3878_v0  ;;  %v3146_v25 = vsel %vm4294_vm5, %v3141_v24, %v3143_v19 }
 0x246   : > { %3154 = vmatprep.subr.mxu0 %v3147_v22 }
 0x24a   : > { %3743 = vmatmul.mubr.msk.f32.vlgmr.msra.gmra.mrb[2].mxu1 %vm1867_vm4, %v3612_v23 }
 0x24b   : > { %3746 = vmatpush3.msra.mxu1 %v3145_v21  ;;  %3747 = vmatprep.mubr.msk.f32.mxu1 %vm4278_vm0, %v3878_v0  ;;  %vm3357_vm0 = vcmask 130048  }
 0x24c   : > { %3613 = vmatmul.mubr.msk.f32.vlgmr.msra.gmra.mrb[2].mxu0 %vm1867_vm4, %v3612_v23  ;;  %v1861_v27 = vpop.permute.xlu0 %1860 }
 0x24d   : > { %3155 = vmatpush1.msra.mxu0 %v3146_v25  ;;  %3218 = vmatprep.mubr.f32.mxu0 %v3878_v0 }
 0x252   : > { %3748 = vmatmul.mubr.msk.f32.vlgmr.msra.gmra.mrb[2].mxu1 %vm1867_vm4, %v3615_v26 }
 0x254   : > { %3616 = vmatmul.mubr.msk.f32.vlgmr.msra.gmra.mrb[2].mxu0 %vm1867_vm4, %v3615_v26 }
 0x255   : > { %3452 = vmatprep.mubr.f32.mxu0 %v3878_v0  ;;  %v3379_v0 = vld [vmem:[%s4266_s6] sm:$0x7] }
 0x325   : > { %v3291_v28 = vpop.f32.mrb[2].mxu1 }
 0x326   : > { %v3755_v29 = vadd.f32 %v3291_v28, %v1861_v27  ;;  %v3749_v30 = vpop.f32.mrb[3].mxu1 }
 0x327   : > { %v3220_v31 = vpop.f32.mrb[2].mxu0 }
 0x328   : > { %v3300_v32 = vmax.f32 %v3755_v29, 0.0  ;;  %v3753_v33 = vadd.f32 %v3220_v31, %v1861_v27  ;;  %v3222_v34 = vpop.f32.mrb[3].mxu0 }
 0x329   : > { %v3754_v36 = vadd.f32 %v3222_v34, %v1861_v27 }
 0x32a   : > { %v3298_v35 = vmax.f32 %v3753_v33, 0.0  ;;  %3349 = vrot.lane.b32.xlu0 %v3300_v32, %s3889_s30 }
 0x32b   : > { %v3299_v37 = vmax.f32 %v3754_v36, 0.0 }
 0x32c   : > { %3302 = vrot.lane.b32.xlu1 %v3298_v35, %s3881_s10  ;;  %s3897_s10 = smov 114  }
 0x32e   : > { %3317 = vrot.lane.b32.xlu0 %v3298_v35, %s3890_s26 }
 0x330   : > { %3305 = vrot.lane.b32.xlu1 %v3298_v35, %s3891_s12 }
 0x332   : > { %3331 = vrot.lane.b32.xlu0 %v3299_v37, %s3882_s11 }
 0x334   : > { %3308 = vrot.lane.b32.xlu1 %v3298_v35, %s3892_s27 }
 0x336   : > { %3334 = vrot.lane.b32.xlu0 %v3299_v37, %s3884_s13  ;;  %s3900_s13 = smov 98  }
 0x338   : > { %3311 = vrot.lane.b32.xlu1 %v3298_v35, %s3893_s14 }
 0x33a   : > { %3337 = vrot.lane.b32.xlu0 %v3299_v37, %s3894_s15 }
 0x33c   : > { %3314 = vrot.lane.b32.xlu1 %v3298_v35, %s3895_s16 }
 0x33e   : > { %3340 = vrot.lane.b32.xlu0 %v3299_v37, %s3896_s28 }
 0x340   : > { %3321 = vrot.lane.b32.xlu1 %v3298_v35, %s3897_s10 }
 0x342   : > { %3343 = vrot.lane.b32.xlu0 %v3299_v37, %s3898_s29 }
 0x344   : > { %3328 = vrot.lane.b32.xlu1 %v3299_v37, %s3899_s8 }
 0x346   : > { %3323 = vrot.lane.b32.xlu0 %v3299_v37, %s3897_s10 }
 0x348   : > { %3347 = vrot.lane.b32.xlu1 %v3299_v37, %s3889_s30 }
 0x34a   : > { %3382 = vperm.xlu0 %3858, %v3379_v0  }
 0x34c   : > { %3354 = vrot.lane.b32.xlu1 %v3300_v32, %s3900_s13 }
 0x39c   : > { %v3350_v38 = vpop.permute.xlu0 %3349 }
 0x39e   : > { %v3303_v39 = vpop.permute.xlu1 %3302 }
 0x39f   : > { %v3358_v53 = vsel %vm3357_vm0, %v3298_v35, %v3303_v39 }
 0x3a0   : > { %v3318_v40 = vpop.permute.xlu0 %3317 }
 0x3a2   : > { %v3306_v41 = vpop.permute.xlu1 %3305 }
 0x3a3   : > { %v3360_v55 = vsel %vm3359_vm6, %v3358_v53, %v3306_v41 }
 0x3a4   : > { %v3332_v42 = vpop.permute.xlu0 %3331 }
 0x3a6   : > { %v3309_v43 = vpop.permute.xlu1 %3308 }
 0x3a7   : > { %v3362_v57 = vsel %vm3361_vm7, %v3360_v55, %v3309_v43 }
 0x3a8   : > { %v3335_v44 = vpop.permute.xlu0 %3334 }
 0x3aa   : > { %v3312_v45 = vpop.permute.xlu1 %3311 }
 0x3ab   : > { %v3364_v61 = vsel %vm3363_vm8, %v3362_v57, %v3312_v45 }
 0x3ac   : > { %v3338_v46 = vpop.permute.xlu0 %3337 }
 0x3ae   : > { %v3315_v47 = vpop.permute.xlu1 %3314 }
 0x3af   : > { %v3366_v1 = vsel %vm3365_vm10, %v3364_v61, %v3315_v47 }
 0x3b0   : > { %v3341_v48 = vpop.permute.xlu0 %3340  ;;  %v3368_v5 = vsel %vm3367_vm11, %v3366_v1, %v3318_v40 }
 0x3b2   : > { %v3322_v49 = vpop.permute.xlu1 %3321 }
 0x3b4   : > { %v3344_v50 = vpop.permute.xlu0 %3343 }
 0x3b6   : > { %v3329_v51 = vpop.permute.xlu1 %3328 }
 0x3b7   : > { %v3371_v52 = vsel %vm3357_vm0, %v3329_v51, %v3332_v42 }
 0x3b8   : > { %v3372_v54 = vsel %vm3359_vm6, %v3371_v52, %v3335_v44  ;;  %v3324_v58 = vpop.permute.xlu0 %3323 }
 0x3b9   : > { %v3373_v56 = vsel %vm3361_vm7, %v3372_v54, %v3338_v46  ;;  %v3326_v2 = vsel %vm3325_vm2, %v3322_v49, %v3324_v58 }
 0x3ba   : > { %v3348_v59 = vpop.permute.xlu1 %3347  ;;  %v3374_v60 = vsel %vm3363_vm8, %v3373_v56, %v3341_v48  ;;  %v3370_v8 = vsel %vm3369_vm12, %v3368_v5, %v3326_v2 }
 0x3bb   : > { %v3352_v62 = vsel %vm3351_vm9, %v3348_v59, %v3350_v38  ;;  %v3375_v63 = vsel %vm3365_vm10, %v3374_v60, %v3344_v50 }
 0x3bc   : > { %v3376_v4 = vsel %vm3367_vm11, %v3375_v63, %v3352_v62 }
 0x3be   : > { %v3355_v3 = vpop.permute.xlu1 %3354 }
 0x3bf   : > { %v3377_v6 = vsel %vm3369_vm12, %v3376_v4, %v3355_v3 }
 0x3c0   : > { %3388 = vmatprep.subr.mxu0 %v3377_v6 }
 0x3c1   : > { %3389 = vmatpush1.msra.mxu0 %v3370_v8 }
 0x3c2   : > { %3618 = vmatmul.mubr.msk.f32.vlgmr.msra.gmra.mrb[4].mxu0 %vm1867_vm4, %v3378_v7 }
 0x3c9   : > { %v3383_v9 = vpop.permute.xlu0 %3382 }
 0x495   : > { %v3454_v10 = vpop.f32.mrb[4].mxu0 }
 0x496   : > { %v3455_v11 = vadd.f32 %v3454_v10, %v3383_v9  ;;  %v3456_v12 = vpop.f32.mrb[5].mxu0 }
 0x497   : > { %v3457_v13 = vadd.f32 %v3456_v12, %v3383_v9 }
 0x498   : > { %v3619_v14 = vmul.f32 -1.442695, %v3455_v11 }
 0x499   : > { %v3620_v15 = vmul.f32 -1.442695, %v3457_v13 }
 0x49a   : > { %3860 = vpow2.f32 %v3619_v14 }
 0x49b   : > { %3862 = vpow2.f32 %v3620_v15 }
 0x4a4   : > { %v3861_v16 = vpop.eup %3860 }
 0x4a5   : > { %v3863_v17 = vpop.eup %3862  ;;  %v3465_v18 = vadd.f32 1.0, %v3861_v16 }
 0x4a6   : > { %v3466_v19 = vadd.f32 1.0, %v3863_v17 }
 0x4a7   : > { %3864 = vrcp.f32 %v3465_v18 }
 0x4a8   : > { %3866 = vrcp.f32 %v3466_v19 }
 0x4b1   : > { %v3865_v20 = vpop.eup %3864 }
 0x4b2   : > { %v3867_v21 = vpop.eup %3866 }
 0x4b3   : > { %v3473_v22 = vcombine.low %v3865_v20, %v3867_v21 }
 0x4b5   : > { %3475 = vst [vmem:[%s278_s22] sm:$0x77] %v3473_v22 }
 0x4b6 PF: > { %s17_s24 = sadd.s32 1, %s3876_s24  }
 0x4b7   : > { %p14_p4 = scmp.ge.s32.totalorder %s17_s24, 4  }
 0x4b9   :  { %16 = sbr.rel (!%p14_p4) target bundleno = 1 (0x1), region = 94 }

</bundles_post_ra>
